<compile_context>
chip_gen: v7x
topology: tpu7x:2x2x1
jax: 0.10.0
libtpu: 0.0.40
codegen_flags: <defaults>
</compile_context>

<pallas_src>
import jax
import jax.numpy as jnp
from jax import lax
from jax.experimental import pallas as pl
from jax.experimental.pallas import tpu as pltpu

_LANE = 128
_SUBLANE = 8

# Tile caps chosen so the worst-case double-buffered VMEM footprint
# (2*tm*tk + 2*tk*tn + 2*tm*tn + tm*tn floats) stays under ~14 MiB — inside the
# default scoped-VMEM limit on v5e (16 MiB), v6e (32 MiB) and v7x (32 MiB).
_MAX_TM = 256
_MAX_TK = 2048
_MAX_TN = 512


def _cdiv(a: int, b: int) -> int:
    return -(-a // b)


def _round_up(n: int, m: int) -> int:
    return ((n + m - 1) // m) * m


def _linear_kernel(x_ref, w_ref, b_ref, o_ref, acc_ref):
    # x_ref: [tm, tk], w_ref: [tk, tn] (pre-transposed, K-major), b_ref: [1, tn],
    # o_ref: [tm, tn], acc_ref: VMEM f32 [tm, tn].
    k = pl.program_id(2)

    @pl.when(k == 0)
    def _init():
        acc_ref[...] = jnp.zeros_like(acc_ref)

    acc_ref[...] += jnp.dot(
        x_ref[...],
        w_ref[...],
        preferred_element_type=jnp.float32,
        precision=lax.Precision.HIGHEST,  # f64-origin module -> most accurate MXU mode
    )

    @pl.when(k == pl.num_programs(2) - 1)
    def _finalize():
        o_ref[...] = (acc_ref[...] + b_ref[...]).astype(o_ref.dtype)


def init_params(weight, bias):
    """One-time parameter preparation (hoisted out of the per-call hot path).

    weight: [out_features, in_features] (PyTorch layout)
    bias:   [out_features]
    Returns (w_t, b_pad, out_features) with
      w_t:   [in_features, N_pad]  float32  (transposed, lane-padded iff N > 128)
      b_pad: [1, N_pad]            float32
    """
    out_features, _ = weight.shape
    # Lane-dense padding only pays off for wide outputs; for a single small tile
    # the masked store is cheaper than pad + per-call slice.
    n_pad = _round_up(out_features, _LANE) if out_features > _LANE else out_features

    w_t = jnp.asarray(weight, jnp.float32).T                 # [K, N]
    b = jnp.asarray(bias, jnp.float32).reshape(1, out_features)
    if n_pad != out_features:
        w_t = jnp.pad(w_t, ((0, 0), (0, n_pad - out_features)))
        b = jnp.pad(b, ((0, 0), (0, n_pad - out_features)))
    return w_t, b, out_features


def _choose_tiles(batch: int, k: int, n_pad: int):
    # M: balanced tiles (tail waste <= 7 rows), sublane-aligned.
    m_tiles = _cdiv(batch, _MAX_TM)
    tm = _round_up(_cdiv(batch, m_tiles), _SUBLANE)
    m_pad = tm * m_tiles

    # N: full extent when small (no (8,128) constraint on full-extent blocks),
    # else the largest lane-multiple tile that divides n_pad (n_pad % 128 == 0).
    if n_pad <= _MAX_TN:
        tn = n_pad
    else:
        tn = next(c for c in (512, 384, 256, 128) if n_pad % c == 0)
    n_tiles = n_pad // tn

    # K: full extent unless large; only tile when it divides evenly (avoids
    # per-call K padding of x).
    tk = k
    if k > _MAX_TK:
        for c in (2048, 1024, 512, 256, 128):
            if k % c == 0:
                tk = c
                break
    k_tiles = k // tk
    return tm, m_pad, m_tiles, tn, n_tiles, tk, k_tiles


def simple_logistic_surrogate(x, w_t, b_pad, out_features):
    """Hot-path forward of the module's nn.Linear: y = x @ W^T + b.

    x:     [batch, in_features]
    w_t:   [in_features, N_pad]  from init_params
    b_pad: [1, N_pad]            from init_params
    Returns [batch, out_features] float32.
    """
    batch, k = x.shape
    k_w, n_pad = w_t.shape
    assert k == k_w, "x / weight in_features mismatch"

    tm, m_pad, m_tiles, tn, n_tiles, tk, k_tiles = _choose_tiles(batch, k, n_pad)

    if x.dtype != jnp.float32:
        x = x.astype(jnp.float32)
    if m_pad != batch:
        x = jnp.pad(x, ((0, m_pad - batch), (0, 0)))

    # Single-buffer operands whose block never changes across the grid
    # (nothing to pipeline -> halve their VMEM footprint).
    if n_tiles == 1 and k_tiles == 1:
        w_spec = pl.BlockSpec((tk, tn), lambda i, j, kk: (kk, j),
                              pipeline_mode=pl.Buffered(1))
    else:
        w_spec = pl.BlockSpec((tk, tn), lambda i, j, kk: (kk, j))
    if n_tiles == 1:
        b_spec = pl.BlockSpec((1, tn), lambda i, j, kk: (0, j),
                              pipeline_mode=pl.Buffered(1))
    else:
        b_spec = pl.BlockSpec((1, tn), lambda i, j, kk: (0, j))

    out = pl.pallas_call(
        _linear_kernel,
        out_shape=jax.ShapeDtypeStruct((m_pad, n_pad), jnp.float32),
        grid=(m_tiles, n_tiles, k_tiles),
        in_specs=[
            pl.BlockSpec((tm, tk), lambda i, j, kk: (i, kk)),  # x tile
            w_spec,                                            # weight [K, N_pad]
            b_spec,                                            # bias   [1, N_pad]
        ],
        out_specs=pl.BlockSpec((tm, tn), lambda i, j, kk: (i, j)),
        scratch_shapes=[pltpu.VMEM((tm, tn), jnp.float32)],
        compiler_params=pltpu.CompilerParams(
            # Reduction (K) axis last and "arbitrary"; M/N shard across the two
            # TensorCores on v7x when the grid has >1 step.
            dimension_semantics=("parallel", "parallel", "arbitrary"),
            vmem_limit_bytes=32 * 1024 * 1024,
        ),
    )(x, w_t, b_pad)

    if m_pad != batch or n_pad != out_features:
        out = out[:batch, :out_features]
    return out


if __name__ == "__main__":
    # Small shapes implied by the module: in_features=32, out_features=16, batch=8.
    batch, in_features, out_features = 8, 32, 16

    key = jax.random.PRNGKey(0)
    kx, kw, kb = jax.random.split(key, 3)

    x = jax.random.normal(kx, (batch, in_features), dtype=jnp.float32)
    # Deterministic init mimicking nn.Linear's uniform(-1/sqrt(in), 1/sqrt(in)).
    bound = 1.0 / float(in_features) ** 0.5
    weight = jax.random.uniform(
        kw, (out_features, in_features), dtype=jnp.float32, minval=-bound, maxval=bound
    )
    bias = jax.random.uniform(
        kb, (out_features,), dtype=jnp.float32, minval=-bound, maxval=bound
    )

    # One-time parameter prep (transpose + pad + cast), outside the hot path.
    w_t, b_pad, n_out = init_params(weight, bias)

    y = simple_logistic_surrogate(x, w_t, b_pad, n_out)
    jax.block_until_ready(y)

    # Sanity check against plain JAX reference.
    y_ref = x @ weight.T + bias
    assert y.shape == (batch, out_features)
    assert jnp.allclose(y, y_ref, atol=1e-5, rtol=1e-5)

    print("KERNEL_OK")
</pallas_src>

<mosaic_0001>
module attributes {stable_mosaic.version = 11 : i64} {
  func.func @_linear_kernel(%arg0: i32, %arg1: i32, %arg2: i32, %arg3: memref<8x32xf32, #tpu.memory_space<vmem>>, %arg4: memref<32x16xf32, #tpu.memory_space<vmem>>, %arg5: memref<1x16xf32, #tpu.memory_space<vmem>>, %arg6: memref<8x16xf32, #tpu.memory_space<vmem>>, %arg7: memref<8x16xf32, #tpu.memory_space<vmem>>) attributes {dimension_semantics = [#tpu.dimension_semantics<parallel>, #tpu.dimension_semantics<parallel>, #tpu.dimension_semantics<arbitrary>], iteration_bounds = array<i64: 1, 1, 1>, scalar_prefetch = 0 : i64, scratch_operands = 1 : i64, tpu.core_type = #tpu.core_type<tc>, window_params = [{transform_indices = @transform_0, window_bounds = array<i64: 8, 32>}, {pipeline_mode = #tpu.pipeline_mode<synchronous>, transform_indices = @transform_1, window_bounds = array<i64: 32, 16>}, {pipeline_mode = #tpu.pipeline_mode<synchronous>, transform_indices = @transform_2, window_bounds = array<i64: 1, 16>}, {transform_indices = @transform_3, window_bounds = array<i64: 8, 16>}]} {
    %c0_i32 = arith.constant 0 : i32
    %0 = arith.cmpi eq, %arg2, %c0_i32 : i32
    %1 = arith.extui %0 : i1 to i32
    %c0_i32_0 = arith.constant 0 : i32
    %2 = arith.cmpi ne, %1, %c0_i32_0 : i32
    scf.if %2 {
      %cst_10 = arith.constant 0.000000e+00 : f32
      %12 = vector.broadcast %cst_10 : f32 to vector<8x16xf32>
      %c0_11 = arith.constant 0 : index
      %c0_12 = arith.constant 0 : index
      %13 = vector.load %arg7[%c0_11, %c0_12] : memref<8x16xf32, #tpu.memory_space<vmem>>, vector<8x16xf32>
      tpu.vector_store %arg7[%c0_11, %c0_12], %12 {strides = array<i32>} : memref<8x16xf32, #tpu.memory_space<vmem>>, vector<8x16xf32>,
    } else {
    }
    %c0 = arith.constant 0 : index
    %c0_1 = arith.constant 0 : index
    %3 = vector.load %arg7[%c0, %c0_1] : memref<8x16xf32, #tpu.memory_space<vmem>>, vector<8x16xf32>
    %c0_2 = arith.constant 0 : index
    %c0_3 = arith.constant 0 : index
    %4 = vector.load %arg3[%c0_2, %c0_3] : memref<8x32xf32, #tpu.memory_space<vmem>>, vector<8x32xf32>
    %c0_4 = arith.constant 0 : index
    %c0_5 = arith.constant 0 : index
    %5 = vector.load %arg4[%c0_4, %c0_5] : memref<32x16xf32, #tpu.memory_space<vmem>>, vector<32x16xf32>
    %cst = arith.constant dense<0.000000e+00> : vector<8x16xf32>
    %6 = tpu.matmul %4, %5, %cst {dimension_numbers = #tpu.dot_dimension_numbers<[1], [0], [0], [1], [0, 0, 1, 1], [], []>, precision = #tpu.contract_precision<fp32>} : vector<8x32xf32>, vector<32x16xf32>, vector<8x16xf32> -> vector<8x16xf32>
    %7 = arith.addf %3, %6 : vector<8x16xf32>
    %c0_6 = arith.constant 0 : index
    %c0_7 = arith.constant 0 : index
    %8 = vector.load %arg7[%c0_6, %c0_7] : memref<8x16xf32, #tpu.memory_space<vmem>>, vector<8x16xf32>
    tpu.vector_store %arg7[%c0_6, %c0_7], %7 {strides = array<i32>} : memref<8x16xf32, #tpu.memory_space<vmem>>, vector<8x16xf32>,
    %c0_i32_8 = arith.constant 0 : i32
    %9 = arith.cmpi eq, %arg2, %c0_i32_8 : i32
    %10 = arith.extui %9 : i1 to i32
    %c0_i32_9 = arith.constant 0 : i32
    %11 = arith.cmpi ne, %10, %c0_i32_9 : i32
    scf.if %11 {
      %c0_10 = arith.constant 0 : index
      %c0_11 = arith.constant 0 : index
      %12 = vector.load %arg7[%c0_10, %c0_11] : memref<8x16xf32, #tpu.memory_space<vmem>>, vector<8x16xf32>
      %c0_12 = arith.constant 0 : index
      %c0_13 = arith.constant 0 : index
      %13 = vector.load %arg5[%c0_12, %c0_13] : memref<1x16xf32, #tpu.memory_space<vmem>>, vector<1x16xf32>
      %14 = vector.broadcast %13 : vector<1x16xf32> to vector<8x16xf32>
      %15 = arith.addf %12, %14 : vector<8x16xf32>
      %c0_14 = arith.constant 0 : index
      %c0_15 = arith.constant 0 : index
      %16 = vector.load %arg6[%c0_14, %c0_15] : memref<8x16xf32, #tpu.memory_space<vmem>>, vector<8x16xf32>
      tpu.vector_store %arg6[%c0_14, %c0_15], %15 {strides = array<i32>} : memref<8x16xf32, #tpu.memory_space<vmem>>, vector<8x16xf32>,
    } else {
    }
    return
  }
  func.func @transform_0(%arg0: i32, %arg1: i32, %arg2: i32) -> (i32, i32) {
    %c0_i32 = arith.constant 0 : i32
    return %arg0, %arg2 : i32, i32
  }
  func.func @transform_1(%arg0: i32, %arg1: i32, %arg2: i32) -> (i32, i32) {
    %c0_i32 = arith.constant 0 : i32
    return %arg2, %arg1 : i32, i32
  }
  func.func @transform_2(%arg0: i32, %arg1: i32, %arg2: i32) -> (i32, i32) {
    %c0_i32 = arith.constant 0 : i32
    %c0_i32_0 = arith.constant 0 : i32
    return %c0_i32, %arg1 : i32, i32
  }
  func.func @transform_3(%arg0: i32, %arg1: i32, %arg2: i32) -> (i32, i32) {
    %c0_i32 = arith.constant 0 : i32
    return %arg0, %arg1 : i32, i32
  }
}

</mosaic_0001>

<bundles_post_ra>
// kernel: tpu_custom_call.1
= control target key start
LH: loop header
LB: loop body
LE: loop exit
PB: predicated region body
PF: predicated region fallthrough
CT: control target
= control target key end

     0   :  { %v707_v3 = vmov 0.0|0.0   ;;  %vm27_vm0 = vcmask 261120   ;;  %vm708_vm1 = vmmov 0   ;;  %v709_v10 = vmov 0.0   ;;  %s789_s0 = inlined_call_operand.vmem [shape: f32[8,32], index: 0, kind: input, shape index: {}]   ;;  %s790_s1 = inlined_call_operand.vmem [shape: f32[32,16], index: 1, kind: input, shape index: {}]   ;;  %s791_s2 = inlined_call_operand.vmem [shape: f32[1,16], index: 2, kind: input, shape index: {}]   ;;  %s792_s3 = inlined_call_operand.hbm [shape: f32[8,16], index: 3, kind: output, shape index: {}]  }
   0x1   :  { %v23_v0 = vld [vmem:[%s790_s1] sm:$0xff]  ;;  %v24_v1 = vld [vmem:[%s790_s1 + $0x8] sm:$0xff]  ;;  %v25_v2 = vld [vmem:[%s790_s1 + $0x10] sm:$0xff]  ;;  %643 = vmatprep.subr.bf16.mxu0 %v707_v3  ;;  %649 = vmatprep.subr.bf16.mxu1 %v707_v3 }
   0x2   :  { %v32_v4 = vand.u32 4294901760, %v23_v0  ;;  %v35_v5 = vand.u32 4294901760, %v24_v1  ;;  %v26_v6 = vld [vmem:[%s790_s1 + $0x18] sm:$0xff]  ;;  %v38_v7 = vand.u32 4294901760, %v25_v2  ;;  %v22_v8 = vld [vmem:[%s789_s0] sm:$0xff]  ;;  %585 = vmatprep.mubr.msk.f32.mxu0 %vm708_vm1, %v709_v10  ;;  %596 = vmatprep.mubr.msk.f32.mxu1 %vm708_vm1, %v709_v10 }
   0x3   :  { %v41_v9 = vand.u32 4294901760, %v26_v6  ;;  %v29_v11 = vsel %vm27_vm0, %v22_v8, 0 }
   0x4   :  { %8 = vsyncpa [#allocation4], 0  ;;  %v644_v12 = vpack.c.bf16 %v35_v5, %v32_v4  ;;  %v112_v13 = vsub.f32 %v23_v0, %v32_v4  ;;  %v119_v14 = vsub.f32 %v24_v1, %v35_v5  ;;  %v126_v15 = vsub.f32 %v25_v2, %v38_v7  ;;  %v546_v60 = vld [vmem:[%s791_s2] ss:$0 sm:$0xff]  ;;  %s710_s22 = smov [#allocation3]  }
   0x5   :  { %v133_v16 = vsub.f32 %v26_v6, %v41_v9  ;;  %v100_v17 = vand.u32 4294901760, %v29_v11  ;;  %v647_v18 = vpack.c.bf16 %v41_v9, %v38_v7  ;;  %vm19_vm2 = vcmask 130048   ;;  %s538_s23 = sshll.u32 %s710_s22, 4  ;;  %s539_s23 = int_to_ptr.vmem [resolvable:$true] %s538_s23 }
   0x6   :  { %645 = vmatpush3.bf16.msra.mxu0 %v644_v12  ;;  %v113_v19 = vand.u32 4294901760, %v112_v13  ;;  %v120_v20 = vand.u32 4294901760, %v119_v14  ;;  %v127_v21 = vand.u32 4294901760, %v126_v15  ;;  %v656_v35 = vpack.c.bf16 %v119_v14, %v112_v13  ;;  %20 = vst.msk [vmem:[#allocation2] sm:$0xff] %vm19_vm2, %v709_v10  ;;  %s683_s24 = scalar_lea.vmem %s539_s23, 128  ;;  %p688_p1 = scmp.lt.s32.totalorder %s539_s23, %s539_s23 }
   0x7   :  { %646 = vmatprep.subr.bf16.mxu0 %v707_v3  ;;  %v101_v22 = vsub.f32 %v29_v11, %v100_v17  ;;  %v134_v23 = vand.u32 4294901760, %v133_v16  ;;  %v659_v38 = vpack.c.bf16 %v133_v16, %v126_v15  ;;  %p684_p0 = scmp.ne.s32.totalorder %s539_s23, %s683_s24  ;;  %p689_p2 = scmp.lt.s32.totalorder %s683_s24, %s683_s24 }
   0x8   :  { %v114_v24 = vsub.f32 %v112_v13, %v113_v19  ;;  %v121_v25 = vsub.f32 %v119_v14, %v120_v20  ;;  %v128_v26 = vsub.f32 %v126_v15, %v127_v21  ;;  %v668_v39 = vpack.c.bf16 %v120_v20, %v113_v19 }
   0x9   :  { %v102_v27 = vand.u32 4294901760, %v101_v22  ;;  %v135_v28 = vsub.f32 %v133_v16, %v134_v23  ;;  %v671_v40 = vpack.c.bf16 %v134_v23, %v127_v21  ;;  %p690_p3 = por %p689_p2, %p688_p1 }
   0xa   :  { %648 = vmatpush3.bf16.msra.mxu0 %v647_v18  ;;  %v115_v29 = vand.u32 4294901760, %v114_v24  ;;  %v122_v30 = vand.u32 4294901760, %v121_v25  ;;  %v129_v31 = vand.u32 4294901760, %v128_v26 }
   0xb   :  { %655 = vmatprep.subr.bf16.mxu0 %v707_v3  ;;  %v103_v32 = vsub.f32 %v101_v22, %v102_v27  ;;  %v136_v33 = vand.u32 4294901760, %v135_v28  ;;  %p691_p4 = pnand %p690_p3, %p684_p0 }
   0xc   :  { %v650_v34 = vpack.c.bf16 %v122_v30, %v115_v29 }
   0xd   :  { %v104_v36 = vand.u32 4294901760, %v103_v32  ;;  %v653_v37 = vpack.c.bf16 %v136_v33, %v129_v31  ;;  %v21_v55 = vld [vmem:[#allocation2] sm:$0xff] }
   0xe   :  { %651 = vmatpush3.bf16.msra.mxu1 %v650_v34 }
   0xf   :  { %586 = vmatmul.mubr.f32.vlgmr.msra.gmra.mrb[0].mxu0 %v104_v36  ;;  %652 = vmatprep.subr.bf16.mxu1 %v707_v3 }
  0x10   :  { %657 = vmatpush3.bf16.msra.mxu0 %v656_v35  ;;  %607 = vmatprep.mubr.msk.f32.mxu0 %vm708_vm1, %v709_v10 }
  0x11   :  { %658 = vmatprep.subr.bf16.mxu0 %v707_v3 }
  0x12   :  { %654 = vmatpush3.bf16.msra.mxu1 %v653_v37 }
  0x13   :  { %661 = vmatprep.subr.bf16.mxu1 %v707_v3 }
  0x14   :  { %660 = vmatpush3.bf16.msra.mxu0 %v659_v38 }
  0x15   :  { %597 = vmatmul.mubr.f32.vlgmr.msra.gmra.mrb[0].mxu1 %v100_v17  ;;  %667 = vmatprep.subr.bf16.mxu0 %v707_v3 }
  0x16   :  { %663 = vmatpush3.bf16.msra.mxu1 %v644_v12  ;;  %618 = vmatprep.mubr.msk.f32.mxu1 %vm708_vm1, %v709_v10 }
  0x17   :  { %608 = vmatmul.mubr.f32.vlgmr.msra.gmra.mrb[2].mxu0 %v101_v22  ;;  %664 = vmatprep.subr.bf16.mxu1 %v707_v3 }
  0x18   :  { %669 = vmatpush3.bf16.msra.mxu0 %v668_v39  ;;  %629 = vmatprep.mubr.msk.f32.mxu0 %vm708_vm1, %v709_v10 }
  0x19   :  { %670 = vmatprep.subr.bf16.mxu0 %v707_v3 }
  0x1a   :  { %666 = vmatpush3.bf16.msra.mxu1 %v647_v18 }
  0x1b   :  { %673 = vmatprep.subr.bf16.mxu1 %v707_v3 }
  0x1c   :  { %672 = vmatpush3.bf16.msra.mxu0 %v671_v40 }
  0x1d   :  { %619 = vmatmul.mubr.f32.vlgmr.msra.gmra.mrb[2].mxu1 %v102_v27 }
  0x1e   :  { %675 = vmatpush3.bf16.msra.mxu1 %v644_v12  ;;  %640 = vmatprep.mubr.msk.f32.mxu1 %vm708_vm1, %v709_v10 }
  0x1f   :  { %630 = vmatmul.mubr.f32.vlgmr.msra.gmra.mrb[4].mxu0 %v100_v17  ;;  %676 = vmatprep.subr.bf16.mxu1 %v707_v3 }
  0x22   :  { %678 = vmatpush3.bf16.msra.mxu1 %v647_v18 }
  0x25   :  { %641 = vmatmul.mubr.f32.vlgmr.msra.gmra.mrb[4].mxu1 %v100_v17 }
  0xe2   :  { %v106_v41 = vpop.f32.mrb[0].mxu0 }
  0xe3   :  { %v587_v42 = vpop.f32.mrb[1].mxu0 }
  0xe8   :  { %v197_v43 = vpop.f32.mrb[0].mxu1 }
  0xe9   :  { %v198_v44 = vadd.f32 %v197_v43, %v106_v41  ;;  %v598_v45 = vpop.f32.mrb[1].mxu1 }
  0xea   :  { %v277_v46 = vpop.f32.mrb[2].mxu0 }
  0xeb   :  { %v278_v47 = vadd.f32 %v277_v46, %v198_v44  ;;  %v609_v48 = vpop.f32.mrb[3].mxu0 }
  0xf0   :  { %v354_v49 = vpop.f32.mrb[2].mxu1 }
  0xf1   :  { %v355_v50 = vadd.f32 %v354_v49, %v278_v47  ;;  %v620_v51 = vpop.f32.mrb[3].mxu1 }
  0xf2   :  { %v437_v52 = vpop.f32.mrb[4].mxu0 }
  0xf3   :  { %v438_v53 = vadd.f32 %v437_v52, %v355_v50  ;;  %v631_v54 = vpop.f32.mrb[5].mxu0 }
  0xf8   :  { %v512_v56 = vpop.f32.mrb[4].mxu1 }
  0xf9   :  { %v513_v57 = vadd.f32 %v512_v56, %v438_v53  ;;  %v642_v58 = vpop.f32.mrb[5].mxu1 }
  0xfb   :  { %v516_v59 = vadd.f32 %v513_v57, %v21_v55 }
  0xfd   :  { %518 = vst.msk [vmem:[#allocation2] sm:$0xff] %vm19_vm2, %v516_v59 }
 0x104   :  { %v522_v61 = vld [vmem:[#allocation2] sm:$0xff] }
 0x105   :  { %v530_v62 = vadd.f32 %v546_v60, %v522_v61 }
 0x107   :  { %531 = vst.msk [vmem:[#allocation3] sm:$0xff] %vm19_vm2, %v530_v62 }
 0x108   :  { %694 = shalt.err (!%p691_p4)
}
 0x109   :  { %s695_s27 = scalar_lea.hbm %s792_s3, 128 }
 0x10a   :  { %p696_p5 = scmp.ne.s32.totalorder %s792_s3, %s695_s27  ;;  %p699_p6 = scmp.lt.u32.totalorder %s695_s27, %s792_s3 }
 0x10c   :  { %p701_p7 = pnand %p699_p6, %p696_p5 }
 0x10e   :  { %704 = shalt.err (!%p701_p7)
}
 0x10f   :  { %541 = dma.vmem_to_hbm [thread:$0]  %s539_s23, 128, %s792_s3, [#allocation4]  }
 0x110   :  { %705 = dma.done.wait [#allocation4], 128  }
 0x111   :  { %706 = vsyncadd [#allocation4], 4294967168 }
 0x112   :  { %545 = vsyncpa [#allocation4], 1 }

</bundles_post_ra>
